<compile_context>
chip_gen: v5e
topology: v5e:2x2
jax: 0.10.0
libtpu: 0.0.40
codegen_flags: <defaults>
</compile_context>

<pallas_src>
import jax
import jax.numpy as jnp
from jax.experimental import pallas as pl
from jax.experimental.pallas import tpu as pltpu

LEAKY_SLOPE = 0.2


def _round_up(x, m):
    return (x + m - 1) // m * m


def _vmem_capacity_bytes():
    """Physical VMEM per TensorCore; falls back to the smallest part (v7x, 64 MiB)."""
    try:
        cap = getattr(pltpu.get_tpu_info(), "vmem_capacity_bytes", None)
        if cap:
            return int(cap)
    except Exception:
        pass
    return 64 << 20


def _downsample_kernel(ev_ref, od_ref, w_ref, b_ref, o_ref):
    # ev_ref: (1, 1, C_pad, TL+128)  even-phase input (x_pad[2t]) with 1-sample halo
    # od_ref: (1, C_pad, TL)         odd-phase input  (x_pad[2t+1])
    # w_ref : (3, C_out_pad, C_pad)  weight-normalized per-tap conv weights (resident)
    # b_ref : (C_out_pad, 1)         bias (resident)
    # o_ref : (1, C_out_pad, TL)
    ev = ev_ref[0, 0]                      # (C_pad, TL+128)
    od = od_ref[0]                         # (C_pad, TL)
    tl = od.shape[-1]
    # out[:, t] = W0 @ x_pad[2t] + W1 @ x_pad[2t+1] + W2 @ x_pad[2t+2]
    y = jnp.dot(w_ref[0], ev[:, :tl], preferred_element_type=jnp.float32)
    y = y + jnp.dot(w_ref[1], od, preferred_element_type=jnp.float32)
    y = y + jnp.dot(w_ref[2], ev[:, 1:tl + 1], preferred_element_type=jnp.float32)
    y = y + b_ref[...].astype(jnp.float32)
    o_ref[0] = jnp.where(y >= 0, y, LEAKY_SLOPE * y).astype(o_ref.dtype)


def downsampling_block(x, v, g, b, *, compute_dtype=None, tl_cap=4096):
    """Forward of DownsamplingBlock (inference / eval mode).

    x: (N, C, L)   v: (C, C, 3) weight_norm direction   g: (C,) scale   b: (C,) bias
    Returns (N, C, L_out), L_out = (L + 2 - 3)//2 + 1.
    compute_dtype: optional MXU operand dtype (e.g. jnp.bfloat16); accumulation stays f32.
    """
    n, c_in_x, l = x.shape
    c_out, c_in, k = v.shape
    assert c_in_x == c_in and k == 3
    stride, pad = 2, 1
    l_out = (l + 2 * pad - k) // stride + 1

    # weight_norm (dim=0): w[o] = g[o] * v[o] / ||v[o]||_F
    vf = v.astype(jnp.float32)
    norm = jnp.sqrt(jnp.sum(vf * vf, axis=(1, 2), keepdims=True))
    w = g.reshape(c_out, 1, 1).astype(jnp.float32) * vf / norm          # (C_out, C_in, K)

    # Dropout(0.1) is identity in the eval-mode forward.
    # TODO(synk): training-mode dropout (mask + 1/0.9 scaling) not implemented.

    op_dtype = x.dtype if compute_dtype is None else jnp.dtype(compute_dtype)
    isz = jnp.dtype(op_dtype).itemsize
    osz = jnp.dtype(x.dtype).itemsize
    sub = max(8, 32 // isz)                 # sublane multiple: 8 for f32, 16 for bf16
    c_pad = _round_up(c_in, sub)
    c_out_pad = _round_up(c_out, sub)

    # ---- Tile geometry: lane-dense TL as large as the generation's VMEM budget allows.
    cap = _vmem_capacity_bytes()
    gate = (24 << 20) if cap <= (64 << 20) else (72 << 20)

    def working_set(tl_):
        ev_blk = c_pad * (tl_ + 128) * isz
        od_blk = c_pad * tl_ * isz
        out_blk = c_out_pad * tl_ * osz
        wts = 3 * c_out_pad * c_pad * isz + c_out_pad * 4
        return 2 * (ev_blk + od_blk + out_blk + wts)     # double-buffered

    tl = min(_round_up(l_out, 128), max(128, tl_cap // 128 * 128))
    while tl > 128 and working_set(tl) > gate:
        tl -= 128
    # TODO(synk): for very large C (contraction depth >~2K) add a third "arbitrary" grid
    # axis over the channel contraction with an f32 accumulator instead of shrinking TL.
    l_out_pad = _round_up(l_out, tl)
    nt = l_out_pad // tl

    # ---- Split x into even/odd conv phases (one fused XLA pass over x; no im2col slab).
    # even_full[t] = x_pad[2t], odd_full[t] = x_pad[2t+1], x_pad = zero-left-pad(x, 1).
    ev_src = x[:, :, 1::2]                  # -> even_full[1 : 1 + L//2]
    od_src = x[:, :, 0::2]                  # -> odd_full [0 : (L+1)//2]
    even_full = jnp.pad(ev_src, ((0, 0), (0, c_pad - c_in),
                                 (1, l_out_pad + 128 - 1 - ev_src.shape[2])))
    odd_full = jnp.pad(od_src, ((0, 0), (0, c_pad - c_in),
                                (0, l_out_pad - od_src.shape[2])))
    # Per-tile even windows with a 1-sample halo, rounded to +128 lanes
    # (duplicates only ~128/TL of the even plane).
    even_win = jnp.stack([even_full[:, :, j * tl: j * tl + tl + 128]
                          for j in range(nt)], axis=1)                  # (N, nt, C_pad, TL+128)
    even_win = even_win.astype(op_dtype)
    odd_full = odd_full.astype(op_dtype)

    # Per-tap weights: wt[k] = W[:, :, k], padded to (C_out_pad, C_pad).
    wt = jnp.transpose(w, (2, 0, 1))                                    # (3, C_out, C_in)
    wt = jnp.pad(wt, ((0, 0), (0, c_out_pad - c_out), (0, c_pad - c_in))).astype(op_dtype)
    b2 = jnp.pad(b.astype(jnp.float32), (0, c_out_pad - c_out)).reshape(c_out_pad, 1)

    grid = (n, nt)
    vmem_need = working_set(tl)
    vmem_limit = max(vmem_need + (4 << 20), 32 << 20)
    vmem_limit = int(min(vmem_limit, cap - (8 << 20), 112 << 20))       # <=56 MiB on v7x

    cost = pl.CostEstimate(
        flops=2 * 3 * n * c_out_pad * c_pad * l_out_pad,
        transcendentals=0,
        bytes_accessed=int(even_win.size) * isz + int(odd_full.size) * isz
                       + int(wt.size) * isz + int(b2.size) * 4
                       + n * c_out_pad * l_out_pad * osz,
    )

    out = pl.pallas_call(
        _downsample_kernel,
        out_shape=jax.ShapeDtypeStruct((n, c_out_pad, l_out_pad), x.dtype),
        grid_spec=pltpu.PrefetchScalarGridSpec(
            num_scalar_prefetch=0,
            grid=grid,
            in_specs=[
                pl.BlockSpec((1, 1, c_pad, tl + 128), lambda i, j: (i, j, 0, 0)),
                pl.BlockSpec((1, c_pad, tl), lambda i, j: (i, 0, j)),
                pl.BlockSpec((3, c_out_pad, c_pad), lambda i, j: (0, 0, 0)),
                pl.BlockSpec((c_out_pad, 1), lambda i, j: (0, 0)),
            ],
            out_specs=pl.BlockSpec((1, c_out_pad, tl), lambda i, j: (i, 0, j)),
        ),
        compiler_params=pltpu.CompilerParams(
            dimension_semantics=("parallel", "parallel"),
            vmem_limit_bytes=vmem_limit,
        ),
        cost_estimate=cost,
    )(even_win, odd_full, wt, b2)
    # No-op when C is a multiple of the sublane pad and L_out a multiple of TL.
    return out[:, :c_out, :l_out]


def _reference(x, v, g, b):
    """Pure-JAX reference (matches PyTorch eval-mode forward)."""
    c_out = v.shape[0]
    norm = jnp.sqrt(jnp.sum(v.astype(jnp.float32) ** 2, axis=(1, 2), keepdims=True))
    w = g.reshape(c_out, 1, 1).astype(jnp.float32) * v.astype(jnp.float32) / norm
    y = jax.lax.conv_general_dilated(
        x, w, window_strides=(2,), padding=[(1, 1)],
        dimension_numbers=("NCH", "OIH", "NCH"),
    )
    y = y + b.reshape(1, c_out, 1)
    return jnp.where(y >= 0, y, LEAKY_SLOPE * y)


if __name__ == "__main__":
    channels, batch, length = 4, 2, 16
    ksize = 3

    key = jax.random.PRNGKey(0)
    kx, kv, kb = jax.random.split(key, 3)

    x = jax.random.normal(kx, (batch, channels, length), dtype=jnp.float32)

    # Conv1d-style uniform init for v and b; g = ||v|| as weight_norm does at wrap time.
    bound = 1.0 / jnp.sqrt(jnp.float32(channels * ksize))
    v = jax.random.uniform(kv, (channels, channels, ksize),
                           minval=-bound, maxval=bound, dtype=jnp.float32)
    g = jnp.sqrt(jnp.sum(v ** 2, axis=(1, 2)))
    b = jax.random.uniform(kb, (channels,), minval=-bound, maxval=bound,
                           dtype=jnp.float32)

    out = jax.block_until_ready(downsampling_block(x, v, g, b))
    ref = jax.block_until_ready(_reference(x, v, g, b))

    assert out.shape == (batch, channels, (length + 2 - ksize) // 2 + 1), out.shape
    assert jnp.allclose(out, ref, atol=1e-5, rtol=1e-5), (
        f"max abs err {jnp.max(jnp.abs(out - ref))}"
    )
    print("KERNEL_OK")
</pallas_src>

<mosaic_0001>
module attributes {stable_mosaic.version = 11 : i64} {
  func.func @_downsample_kernel(%arg0: i32, %arg1: i32, %arg2: memref<1x1x8x256xf32, #tpu.memory_space<vmem>>, %arg3: memref<1x8x128xf32, #tpu.memory_space<vmem>>, %arg4: memref<3x8x8xf32, #tpu.memory_space<vmem>>, %arg5: memref<8x1xf32, #tpu.memory_space<vmem>>, %arg6: memref<1x8x128xf32, #tpu.memory_space<vmem>>) attributes {dimension_semantics = [#tpu.dimension_semantics<parallel>, #tpu.dimension_semantics<parallel>], iteration_bounds = array<i64: 2, 1>, scalar_prefetch = 0 : i64, scratch_operands = 0 : i64, tpu.core_type = #tpu.core_type<tc>, window_params = [{transform_indices = @transform_0, window_bounds = array<i64: 1, 1, 8, 256>}, {transform_indices = @transform_1, window_bounds = array<i64: 1, 8, 128>}, {pipeline_mode = #tpu.pipeline_mode<synchronous>, transform_indices = @transform_2, window_bounds = array<i64: 3, 8, 8>}, {pipeline_mode = #tpu.pipeline_mode<synchronous>, transform_indices = @transform_3, window_bounds = array<i64: 8, 1>}, {transform_indices = @transform_4, window_bounds = array<i64: 1, 8, 128>}]} {
    %c0 = arith.constant 0 : index
    %c0_0 = arith.constant 0 : index
    %c0_1 = arith.constant 0 : index
    %c0_2 = arith.constant 0 : index
    %0 = vector.load %arg2[%c0, %c0_0, %c0_1, %c0_2] : memref<1x1x8x256xf32, #tpu.memory_space<vmem>>, vector<1x1x8x256xf32>
    %1 = vector.shape_cast %0 : vector<1x1x8x256xf32> to vector<8x256xf32>
    %c0_3 = arith.constant 0 : index
    %c0_4 = arith.constant 0 : index
    %c0_5 = arith.constant 0 : index
    %2 = vector.load %arg3[%c0_3, %c0_4, %c0_5] : memref<1x8x128xf32, #tpu.memory_space<vmem>>, vector<1x8x128xf32>
    %3 = vector.shape_cast %2 : vector<1x8x128xf32> to vector<8x128xf32>
    %c0_6 = arith.constant 0 : index
    %c0_7 = arith.constant 0 : index
    %c0_8 = arith.constant 0 : index
    %4 = vector.load %arg4[%c0_6, %c0_7, %c0_8] : memref<3x8x8xf32, #tpu.memory_space<vmem>>, vector<1x8x8xf32>
    %5 = vector.shape_cast %4 : vector<1x8x8xf32> to vector<8x8xf32>
    %6 = vector.extract_strided_slice %1 {offsets = [0, 0], sizes = [8, 128], strides = [1, 1]} : vector<8x256xf32> to vector<8x128xf32>
    %cst = arith.constant dense<0.000000e+00> : vector<8x128xf32>
    %7 = tpu.matmul %5, %6, %cst {dimension_numbers = #tpu.dot_dimension_numbers<[1], [0], [0], [1], [0, 0, 1, 1], [], []>} : vector<8x8xf32>, vector<8x128xf32>, vector<8x128xf32> -> vector<8x128xf32>
    %c1 = arith.constant 1 : index
    %c0_9 = arith.constant 0 : index
    %c0_10 = arith.constant 0 : index
    %8 = vector.load %arg4[%c1, %c0_9, %c0_10] : memref<3x8x8xf32, #tpu.memory_space<vmem>>, vector<1x8x8xf32>
    %9 = vector.shape_cast %8 : vector<1x8x8xf32> to vector<8x8xf32>
    %cst_11 = arith.constant dense<0.000000e+00> : vector<8x128xf32>
    %10 = tpu.matmul %9, %3, %cst_11 {dimension_numbers = #tpu.dot_dimension_numbers<[1], [0], [0], [1], [0, 0, 1, 1], [], []>} : vector<8x8xf32>, vector<8x128xf32>, vector<8x128xf32> -> vector<8x128xf32>
    %11 = arith.addf %7, %10 : vector<8x128xf32>
    %c2 = arith.constant 2 : index
    %c0_12 = arith.constant 0 : index
    %c0_13 = arith.constant 0 : index
    %12 = vector.load %arg4[%c2, %c0_12, %c0_13] : memref<3x8x8xf32, #tpu.memory_space<vmem>>, vector<1x8x8xf32>
    %13 = vector.shape_cast %12 : vector<1x8x8xf32> to vector<8x8xf32>
    %14 = vector.extract_strided_slice %1 {offsets = [0, 1], sizes = [8, 128], strides = [1, 1]} : vector<8x256xf32> to vector<8x128xf32>
    %cst_14 = arith.constant dense<0.000000e+00> : vector<8x128xf32>
    %15 = tpu.matmul %13, %14, %cst_14 {dimension_numbers = #tpu.dot_dimension_numbers<[1], [0], [0], [1], [0, 0, 1, 1], [], []>} : vector<8x8xf32>, vector<8x128xf32>, vector<8x128xf32> -> vector<8x128xf32>
    %16 = arith.addf %11, %15 : vector<8x128xf32>
    %c0_15 = arith.constant 0 : index
    %c0_16 = arith.constant 0 : index
    %17 = vector.load %arg5[%c0_15, %c0_16] : memref<8x1xf32, #tpu.memory_space<vmem>>, vector<8x1xf32>
    %18 = vector.broadcast %17 : vector<8x1xf32> to vector<8x128xf32>
    %19 = arith.addf %16, %18 : vector<8x128xf32>
    %cst_17 = arith.constant 0.000000e+00 : f32
    %20 = vector.broadcast %cst_17 : f32 to vector<8x128xf32>
    %21 = arith.cmpf oge, %19, %20 : vector<8x128xf32>
    %cst_18 = arith.constant 2.000000e-01 : f32
    %22 = vector.broadcast %cst_18 : f32 to vector<8x128xf32>
    %23 = arith.mulf %22, %19 : vector<8x128xf32>
    %24 = arith.select %21, %19, %23 : vector<8x128xi1>, vector<8x128xf32>
    %c0_19 = arith.constant 0 : index
    %c0_20 = arith.constant 0 : index
    %c0_21 = arith.constant 0 : index
    %25 = vector.load %arg6[%c0_19, %c0_20, %c0_21] : memref<1x8x128xf32, #tpu.memory_space<vmem>>, vector<1x8x128xf32>
    %26 = vector.shape_cast %25 : vector<1x8x128xf32> to vector<8x128xf32>
    %27 = vector.shape_cast %24 : vector<8x128xf32> to vector<1x8x128xf32>
    tpu.vector_store %arg6[%c0_19, %c0_20, %c0_21], %27 {strides = array<i32>} : memref<1x8x128xf32, #tpu.memory_space<vmem>>, vector<1x8x128xf32>,
    return
  }
  func.func @transform_0(%arg0: i32, %arg1: i32) -> (i32, i32, i32, i32) {
    %c0_i32 = arith.constant 0 : i32
    %c0_i32_0 = arith.constant 0 : i32
    %c0_i32_1 = arith.constant 0 : i32
    return %arg0, %arg1, %c0_i32, %c0_i32_0 : i32, i32, i32, i32
  }
  func.func @transform_1(%arg0: i32, %arg1: i32) -> (i32, i32, i32) {
    %c0_i32 = arith.constant 0 : i32
    %c0_i32_0 = arith.constant 0 : i32
    return %arg0, %c0_i32, %arg1 : i32, i32, i32
  }
  func.func @transform_2(%arg0: i32, %arg1: i32) -> (i32, i32, i32) {
    %c0_i32 = arith.constant 0 : i32
    %c0_i32_0 = arith.constant 0 : i32
    %c0_i32_1 = arith.constant 0 : i32
    %c0_i32_2 = arith.constant 0 : i32
    return %c0_i32, %c0_i32_0, %c0_i32_1 : i32, i32, i32
  }
  func.func @transform_3(%arg0: i32, %arg1: i32) -> (i32, i32) {
    %c0_i32 = arith.constant 0 : i32
    %c0_i32_0 = arith.constant 0 : i32
    %c0_i32_1 = arith.constant 0 : i32
    return %c0_i32, %c0_i32_0 : i32, i32
  }
  func.func @transform_4(%arg0: i32, %arg1: i32) -> (i32, i32, i32) {
    %c0_i32 = arith.constant 0 : i32
    %c0_i32_0 = arith.constant 0 : i32
    return %arg0, %c0_i32, %arg1 : i32, i32, i32
  }
}

</mosaic_0001>

<bundles_post_ra>
// kernel: tpu_custom_call.1
= control target key start
LH: loop header
LB: loop body
LE: loop exit
PB: predicated region body
PF: predicated region fallthrough
CT: control target
= control target key end

     0   :  { %s1010_s0 = inlined_call_operand.hbm [shape: f32[2,1,8,256], index: 0, kind: input, shape index: {}]   ;;  %s1011_s1 = inlined_call_operand.hbm [shape: f32[2,8,128], index: 1, kind: input, shape index: {}]   ;;  %s1012_s2 = inlined_call_operand.hbm [shape: f32[3,8,8], index: 2, kind: input, shape index: {}]   ;;  %s1013_s3 = inlined_call_operand.vmem [shape: f32[8,1], index: 3, kind: input, shape index: {}]   ;;  %s1014_s4 = inlined_call_operand.hbm [shape: f32[2,8,128], index: 4, kind: output, shape index: {}]  }
   0x1   :  { %1019 = sst [smem:[#allocation18_spill]] %s1012_s2 }
   0x2   :  { %9 = vsyncpa [#allocation3], 0 }
   0x3   :  { %11 = vsyncpa [#allocation3 + $0x1], 0 }
   0x4   :  { %12 = vsyncpa [#allocation6], 0 }
   0x5   :  { %14 = vsyncpa [#allocation6 + $0x1], 0 }
   0x6   :  { %15 = vsyncpa [#allocation4], 0 }
   0x7   :  { %17 = vsyncpa [#allocation4 + $0x1], 0  ;;  %s846_s15 = smov 0   ;;  %s848_s16 = smov 0  }
   0x8   :  { %s850_s17 = smov 0   ;;  %s852_s18 = smov 0  }
   0x9   :  { %s854_s19 = smov 0   ;;  %s856_s20 = smov 0  }
   0xa LB: > { %1020 = sst [smem:[#allocation13_spill]] %s794_s15  ;;  %s877_s21 = sadd.s32 4294967295, %s814_s20   ;;  %s814_s20 = sphi %s856_s20, %s23_s20   ;;  %s810_s19 = sphi %s854_s19, %s1039_s19   ;;  %s806_s18 = sphi %s852_s18, %s1038_s18   ;;  %s802_s17 = sphi %s850_s17, %s1034_s17   ;;  %s798_s16 = sphi %s848_s16, %s1037_s16   ;;  %s794_s15 = sphi %s846_s15, %s1036_s15  }
   0xb   : > { %1021 = sst [smem:[#allocation14_spill]] %s802_s17  ;;  %p525_p0 = scmp.ge.s32.totalorder %s814_s20, 1 }
   0xc   : > { %p58_p1 = scmp.eq.s32.totalorder %s877_s21, 0  ;;  %p166_p2 = scmp.lt.s32.totalorder %s814_s20, 3 }
   0xd   : > { %s1022_s2 = sld [smem:[#allocation18_spill]]  ;;  %s816_s26 = smov [#allocation7]  }
   0xe   : > { %p885_p3 = pnand %p525_p0, %p166_p2  ;;  %s179_s27 = sshll.u32 %s816_s26, 4  ;;  %s180_s27 = int_to_ptr.vmem [resolvable:$true] %s179_s27 }
   0xf   : > { %p527_p6 = scmp.ge.s32.totalorder %s814_s20, 2  ;;  %s817_s28 = smov 128  }
  0x10   : > { %p556_p4 = pneg %p885_p3  ;;  %s818_s29 = smov 8  }
  0x11   : > { %s524_s30 = sadd.s32 4294967294, %s814_s20   ;;  %s35_s5 = sadd.s32 1, %s810_s19 }
  0x12   : > { %p557_p5 = pnand %p556_p4, %p58_p1  ;;  %s44_s6 = sadd.s32 1, %s802_s17 }
  0x13   : > { %s177_s24 = sshll.u32 %s1022_s2, 4  ;;  %p37_p7 = scmp.ge.s32.totalorder %s35_s5, 2  ;;  %s178_s24 = int_to_ptr.hbm [resolvable:$true] %s177_s24 }
  0x14   : > { %559 = dma.hbm_to_vmem [thread:$0]  (!%p557_p5), %s178_s24, 384, %s180_s27, [#allocation6], %s817_s28, %s817_s28, %s818_s29  }
  0x15   : > { %p51_p8 = scmp.ne.s32.totalorder %s802_s17, %s798_s16  ;;  %p52_p9 = scmp.eq.s32.totalorder %s814_s20, 0 }
  0x16   : > { %p57_p10 = scmp.ne.s32.totalorder %s798_s16, %s794_s15  ;;  %s1041_s5 = smov (%p37_p7, %s35_s5), 0 }
  0x17   : > { %1024 = sst [smem:[#allocation15_spill]] %s1041_s5  ;;  %p904_p11 = por %p52_p9, %p51_p8 }
  0x18   : > { %p910_p12 = por %p58_p1, %p57_p10  ;;  %s39_s9 = ssub.s32 %s810_s19, %s1041_s5 }
  0x19   : > { %p153_p13 = scmp.eq.s32.totalorder %s877_s21, 1  ;;  %p42_p0 = scmp.eq.s32.totalorder %s39_s9, 0 }
  0x1a   : > { %p159_p2 = scmp.eq.s32.totalorder %s524_s30, 1  ;;  %p572_p5 = scmp.lt.s32.totalorder %s814_s20, 2 }
  0x1b   : > { %p917_p4 = por %p153_p13, %p51_p8  ;;  %s196_s13 = sand.u32 1, %s802_s17  }
  0x1c   : > { %s923_s11 = scalar_select %p42_p0, %s802_s17, %s44_s6  }
  0x1d   : > { %p925_p7 = por %p159_p2, %p57_p10  ;;  %s528_s14 = sshll.u32 %s196_s13, 4 }
  0x1e   : > { %1028 = sst [smem:[#allocation16_spill]] %s923_s11  ;;  %s545_s22 = sshll.u32 %s810_s19, 4 }
  0x1f   : > { %s1029_s12 = scalar_select %p925_p7, 1, 0 }
  0x20   : > { %s207_s26 = scalar_lea.hbm %s1010_s0, %s545_s22  ;;  %s200_s27 = scalar_lea.vmem [#allocation2], %s528_s14 }
  0x21   : > { %1030 = sst [smem:[#allocation17_spill]] %s1029_s12  ;;  %s211_s28 = sshll.u32 %s200_s27, 4  ;;  %s212_s28 = int_to_ptr.vmem [resolvable:$true] %s211_s28 }
  0x22   : > { %s209_s29 = sshll.u32 %s207_s26, 4  ;;  %p561_p8 = pnand %p572_p5, %p904_p11  ;;  %s210_s29 = int_to_ptr.hbm [resolvable:$true] %s209_s29 }
  0x23   : > { %s218_s30 = sand.u32 1, %s814_s20   ;;  %s531_s6 = sshll.u32 %s196_s13, 3 }
  0x24   : > { %s197_s9 = scalar_lea.sflag [#allocation3], %s196_s13  ;;  %s532_s2 = sshll.u32 %s810_s19, 3 }
  0x25   : > { %563 = dma.hbm_to_vmem [thread:$0]  (!%p561_p8), %s210_s29, 256, %s212_s28, %s197_s9  }
  0x26   : > { %s227_s17 = scalar_lea.hbm %s1011_s1, %s532_s2  ;;  %s222_s12 = scalar_lea.vmem [#allocation5], %s531_s6 }
  0x27   : > { %s231_s15 = sshll.u32 %s222_s12, 4  ;;  %s229_s23 = sshll.u32 %s227_s17, 4  ;;  %s232_s15 = int_to_ptr.vmem [resolvable:$true] %s231_s15  ;;  %s230_s23 = int_to_ptr.hbm [resolvable:$true] %s229_s23 }
  0x28   : > { %s219_s14 = scalar_lea.sflag [#allocation6], %s218_s30  ;;  %240 = sbr.rel (%p885_p3) target bundleno = 315 (0x13b), region = 36 }
  0x29   : > { %566 = dma.hbm_to_vmem [thread:$0]  (!%p561_p8), %s230_s23, 128, %s232_s15, %s219_s14  }
  0x2a   : > { %s944_s7 = sand.u32 (!%p885_p3), 1, %s798_s16  }
  0x2b   : > { %s534_s13 = sshll.u32 (!%p885_p3), %s944_s7, 4  ;;  %s243_s22 = scalar_lea.sflag (!%p885_p3), [#allocation3], %s944_s7 }
  0x2c   : > { %s246_s5 = scalar_lea.vmem (!%p885_p3), [#allocation2], %s534_s13 }
  0x2d   : > { %777 = dma.done.wait (%p910_p12), %s243_s22, 256  }
  0x2e   : > { %779 = vsyncadd (%p910_p12), %s243_s22, 4294967040  ;;  %s252_s2 = sand.u32 1, %s877_s21   ;;  %s535_s15 = sshll.u32 %s944_s7, 3 }
  0x2f   : > { %s253_s17 = scalar_lea.sflag [#allocation6], %s252_s2  ;;  %s256_s25 = scalar_lea.vmem [#allocation5], %s535_s15 }
  0x30   : > { %781 = dma.done.wait (%p910_p12), %s253_s17, 128  }
  0x31   : > { %783 = vsyncadd (%p910_p12), %s253_s17, 4294967168 }
  0x32   : > { %785 = dma.done.wait (%p58_p1), [#allocation6], 384  }
  0x33   : > { %787 = vsyncadd (%p58_p1), [#allocation6], 4294966912  ;;  %v292_v0 = vld [vmem:[%s246_s5] sm:$0xff]  ;;  %v293_v1 = vld [vmem:[%s246_s5 + $0x8] sm:$0xff]  ;;  %s819_s11 = smov 127   ;;  %vm298_vm0 = vcmask 64512  }
  0x34   : > { %v628_v2 = vpack.i.bf16 %v293_v1, %v292_v0  ;;  %340 = vmatpush.msra.mxu1 %v292_v0  ;;  %v294_v3 = vld [vmem:[%s256_s25] sm:$0xff]  ;;  %v297_v4 = vld [vmem:[#allocation7 + $0x8] sm:$0xff]  ;;  %v295_v5 = vld [vmem:[#allocation7] sm:$0xff]  ;;  %v820_v7 = vmov 0   ;;  %vm353_vm1 = vcmask 1039360   ;;  %s542_s21 = sshll.u32 %s806_s18, 3 }
  0x35   : > { %317 = vmatpush.msra.mxu0 %v294_v3  ;;  %539 = vmatmul.msk.f32.vlgmr.msra.gmra.mxu1 %vm298_vm0, %v295_v5  ;;  %v380_v6 = vld [vmem:[%s1013_s3] sm:$0xff]  ;;  %s403_s27 = scalar_lea.hbm %s1014_s4, %s542_s21  ;;  %s291_s28 = scalar_lea.vmem [#allocation8], %s535_s15 }
  0x36   : > { %629 = vrot.lane.b32.xlu0 %v628_v2, %s819_s11  ;;  %538 = vmatmul.msk.f32.vlgmr.msra.gmra.mxu0 %vm298_vm0, %v297_v4  ;;  %v346_v11 = vld [vmem:[#allocation7 + $0x10] sm:$0xff]  ;;  %s405_s29 = sshll.u32 %s291_s28, 4  ;;  %s407_s30 = sshll.u32 %s403_s27, 4  ;;  %s406_s29 = int_to_ptr.vmem [resolvable:$true] %s405_s29  ;;  %s408_s30 = int_to_ptr.hbm [resolvable:$true] %s407_s30 }
  0x37   : > { %633 = vset.pattern.permute.xlu0 %v820_v7  ;;  %s392_s18 = scalar_lea.sflag [#allocation4], %s944_s7  ;;  %s738_s6 = sshra.s32 %s408_s30, 4  ;;  %s739_s6 = int_to_ptr.hbm [resolvable:$true] %s738_s6 }
  0x38   : > { %s740_s9 = scalar_lea.hbm %s739_s6, 8  ;;  %s744_s13 = scalar_lea.hbm %s1014_s4, 16 }
  0x39   : > { %p741_p1 = scmp.ne.s32.totalorder %s739_s6, %s740_s9  ;;  %p745_p10 = scmp.lt.s32.totalorder %s739_s6, %s1014_s4 }
  0x3a   : > { %p746_p11 = scmp.lt.s32.totalorder %s744_s13, %s740_s9 }
  0x3b   : > { %p742_p3 = pnand %p741_p1, %p917_p4 }
  0x3c   : > { %p747_p12 = por %p746_p11, %p745_p10 }
  0x3d   : > { %p743_p9 = pneg %p742_p3 }
  0x3e   : > { %383 = vperm.xlu0 %633, %v380_v6  }
  0x3f   : > { %p748_p13 = pnand %p747_p12, %p743_p9 }
  0xa8   : > { %v630_v8 = vpop.permute.xlu0 %629 }
  0xa9   : > { %v632_v9 = vunpack.i.h.bf16 %v630_v8  ;;  %v631_v10 = vunpack.i.l.bf16 %v630_v8 }
  0xab   : > { %v354_v12 = vsel %vm353_vm1, %v631_v10, %v632_v9 }
  0xac   : > { %374 = vmatpush.msra.mxu2 %v354_v12 }
  0xad   : > { %540 = vmatmul.msk.f32.vlgmr.msra.gmra.mxu2 %vm298_vm0, %v346_v11 }
  0xb0   : > { %v384_v17 = vpop.permute.xlu0 %383 }
  0xb2   : > { %v342_v14 = vpop.f32.mrf.mxu1 }
  0xb3   : > { %v319_v13 = vpop.f32.mrf.mxu0 }
  0xb4   : > { %v343_v15 = vadd.f32 %v342_v14, %v319_v13 }
 0x130   : > { %v376_v16 = vpop.f32.mrf.mxu2 }
 0x131   : > { %v379_v18 = vadd.f32 %v376_v16, %v343_v15 }
 0x133   : > { %v386_v19 = vadd.f32 %v384_v17, %v379_v18 }
 0x135   : > { %vm387_vm2 = vcmp.ge.f32.partialorder %v386_v19, 0.0  ;;  %v388_v20 = vmul.f32 0.2, %v386_v19 }
 0x137   : > { %v389_v21 = vsel %vm387_vm2, %v386_v19, %v388_v20 }
 0x138   : > { %390 = vst [vmem:[%s291_s28] sm:$0xff] %v389_v21 }
 0x139   : > { %751 = shalt.err (!%p748_p13)
}
 0x13a   : > { %554 = dma.vmem_to_hbm [thread:$0]  (%p917_p4), %s406_s29, 128, %s408_s30, %s392_s18  }
 0x13b PF: > { %s1031_s7 = sld [smem:[#allocation13_spill]]  ;;  %p568_p0 = pnand %p527_p6, %p925_p7 }
 0x13d   : > { %p569_p2 = pneg %p568_p0 }
 0x141   : > { %s419_s15 = sand.u32 1, %s1031_s7  }
 0x142   : > { %s420_s17 = scalar_lea.sflag [#allocation4], %s419_s15 }
 0x143   : > { %789 = dma.done.wait (%p569_p2), %s420_s17, 128  }
 0x144   : > { %791 = vsyncadd (%p569_p2), %s420_s17, 4294967168  ;;  %s23_s20 = sadd.s32 1, %s814_s20   ;;  %s1033_s25 = sld [smem:[#allocation14_spill]] }
 0x145   : > { %p20_p5 = scmp.ge.s32.totalorder %s23_s20, 4   ;;  %s1034_s17 = sld [smem:[#allocation16_spill]] }
 0x146   : > { %s1035_s10 = sld [smem:[#allocation15_spill]]  ;;  %s1036_s15 = smov %s798_s16 }
 0x147   : > { %s1038_s18 = smov %s810_s19 }
 0x148   :  { %22 = sbr.rel (!%p20_p5) target bundleno = 10 (0xa), region = 100 }
 0x14a   : > { %s1037_s16 = smov %s1033_s25 }
 0x14c   : > { %s1039_s19 = smov %s1035_s10 }
 0x14d   :  { %426 = vsyncpa [#allocation3], 1 }
 0x14e   :  { %428 = vsyncpa [#allocation3 + $0x1], 1 }
 0x14f   :  { %429 = vsyncpa [#allocation6], 1 }
 0x150   :  { %431 = vsyncpa [#allocation6 + $0x1], 1 }
 0x151   :  { %432 = vsyncpa [#allocation4], 1 }
 0x152   :  { %434 = vsyncpa [#allocation4 + $0x1], 1 }

</bundles_post_ra>
